<compile_context>
chip_gen: v6e
topology: v6e:2x2x1
jax: 0.10.0
libtpu: 0.0.40
codegen_flags: <defaults>
</compile_context>

<pallas_src>
import jax
import jax.numpy as jnp
from jax import lax
from jax.experimental import pallas as pl
from jax.experimental.pallas import tpu as pltpu

GELU_GAMMA = 1.7015043497085571   # timm _nonlin_gamma['gelu']
SQRT1_2 = 0.7071067811865476


def _gelu_exact(x):
    # PyTorch F.gelu default (erf formulation)
    return 0.5 * x * (1.0 + lax.erf(x * SQRT1_2))


# ----------------------------- Pallas kernel ------------------------------ #
def scse_kernel(x_ref, w1_ref, b1_ref, w2_ref, b2_ref, wsp_ref, out_ref):
    nb, C, S = x_ref.shape
    w1t = w1_ref[...]    # (C, Cr)  fc1 weight, transposed
    b1 = b1_ref[...]     # (1, Cr)
    w2 = w2_ref[...]     # (C, Cr)  fc2 weight
    b2 = b2_ref[...]     # (C, 1)
    wsp = wsp_ref[...]   # (1, C)   spatial-SE weight

    for b in range(nb):  # nb is small & static -> unrolled
        xb = x_ref[b].astype(jnp.float32)                          # (C, S)

        # ---- channel SE: global avg pool -> fc1 -> gamma*gelu -> fc2 -> sigmoid
        pooled = jnp.mean(xb, axis=1, keepdims=True)               # (C, 1)
        z1 = jnp.sum(w1t * pooled, axis=0, keepdims=True) + b1     # (1, Cr)
        z1 = _gelu_exact(z1) * GELU_GAMMA
        z2 = jnp.sum(w2 * z1, axis=1, keepdims=True) + b2          # (C, 1)
        chn_gate = jax.nn.sigmoid(z2)                              # (C, 1)

        # ---- spatial SE: 1x1 conv C->1 (no bias) -> sigmoid; lane-dense (1, S)
        s = jnp.dot(wsp, xb, preferred_element_type=jnp.float32)   # (1, S)
        spa_gate = jax.nn.sigmoid(s)

        # fused output == torch.cat([chn_se, spa_se], dim=1)
        out_ref[b, 0:C, :] = (xb * chn_gate).astype(out_ref.dtype)
        out_ref[b, C:2 * C, :] = (xb * spa_gate).astype(out_ref.dtype)


# ------------------------------ JAX glue ---------------------------------- #
def scaled_std_weight(w, gain, gamma=1.0, eps=1e-6):
    """ScaledStdConv2dSame weight standardization (matches the F.batch_norm path)."""
    out_ch = w.shape[0]
    fan_in = w[0].size
    scale = gamma * fan_in ** -0.5
    wf = w.reshape(out_ch, -1)
    mean = jnp.mean(wf, axis=1, keepdims=True)
    var = jnp.var(wf, axis=1, keepdims=True)          # biased variance, like batch_norm
    wf = (wf - mean) / jnp.sqrt(var + eps) * (gain.reshape(out_ch, 1) * scale)
    return wf.reshape(w.shape)


def scse_scaled_forward(x_nchw, params, *, vmem_budget_bytes=12 * 1024 * 1024,
                        max_nb=8):
    N, C, H, W = x_nchw.shape
    S = H * W
    Cr = params["w1"].shape[0]
    dtype = x_nchw.dtype

    # Standardize 1x1 conv weights, reshape to the layouts the kernel expects.
    w1t = scaled_std_weight(params["w1"], params["g1"]).reshape(Cr, C).T.astype(jnp.float32)  # (C, Cr)
    w2m = scaled_std_weight(params["w2"], params["g2"]).reshape(C, Cr).astype(jnp.float32)    # (C, Cr)
    wsp = scaled_std_weight(params["wsp"], params["gsp"]).reshape(1, C).astype(jnp.float32)   # (1, C)
    b1 = params["b1"].reshape(1, Cr).astype(jnp.float32)
    b2 = params["b2"].reshape(C, 1).astype(jnp.float32)

    # Native layout: NCHW -> (N, C, S) is a free reshape; dtype is preserved.
    x = x_nchw.reshape(N, C, S)

    # Images per grid step: amortize per-step pipeline overhead for small maps,
    # stay under the smallest default scoped-VMEM limit (v5e 16 MiB), and keep
    # >= 2 grid steps so v7x megacore can split the batch.
    itemsize = jnp.dtype(dtype).itemsize
    per_image = 6 * C * S * itemsize          # (1 in + 2 out) x double-buffered
    nb = max(1, min(N, max_nb, vmem_budget_bytes // max(per_image, 1)))
    while N % nb:
        nb -= 1
    if N >= 2 and N // nb < 2 and nb > 1:
        nb = nb // 2
        while N % nb:
            nb -= 1
    # TODO(synk): for very large feature maps where even nb=1 exceeds the VMEM
    # budget (e.g. 56x56x256 f32 on v7x), add an S-tiling grid axis: accumulate
    # the pooled sum across S tiles and apply the channel gate on a second pass.

    cp_kwargs = dict(dimension_semantics=("parallel",))
    step_bytes = per_image * nb
    if step_bytes > 16 * 1024 * 1024:   # beyond the smallest default scoped limit
        cp_kwargs["vmem_limit_bytes"] = min(step_bytes + (4 << 20), 120 << 20)

    out = pl.pallas_call(
        scse_kernel,
        out_shape=jax.ShapeDtypeStruct((N, 2 * C, S), dtype),
        grid=(N // nb,),
        in_specs=[
            pl.BlockSpec((nb, C, S), lambda n: (n, 0, 0)),   # x block
            pl.BlockSpec((C, Cr), lambda n: (0, 0)),         # fc1 weight^T
            pl.BlockSpec((1, Cr), lambda n: (0, 0)),         # fc1 bias
            pl.BlockSpec((C, Cr), lambda n: (0, 0)),         # fc2 weight
            pl.BlockSpec((C, 1), lambda n: (0, 0)),          # fc2 bias
            pl.BlockSpec((1, C), lambda n: (0, 0)),          # spatial SE weight
        ],
        out_specs=pl.BlockSpec((nb, 2 * C, S), lambda n: (n, 0, 0)),
        compiler_params=pltpu.CompilerParams(**cp_kwargs),
    )(x, w1t, b1, w2m, b2, wsp)

    # (N, 2C, S) -> (N, 2C, H, W) is a free reshape (mode='concat' along channels).
    return out.reshape(N, 2 * C, H, W)


# -------------------------- pure-JAX reference ----------------------------- #
def scse_reference(x_nchw, params):
    N, C, H, W = x_nchw.shape
    Cr = params["w1"].shape[0]
    w1 = scaled_std_weight(params["w1"], params["g1"]).reshape(Cr, C)
    w2 = scaled_std_weight(params["w2"], params["g2"]).reshape(C, Cr)
    wsp = scaled_std_weight(params["wsp"], params["gsp"]).reshape(1, C)

    pooled = jnp.mean(x_nchw, axis=(2, 3))                        # (N, C)
    z1 = pooled @ w1.T + params["b1"]
    z1 = _gelu_exact(z1) * GELU_GAMMA
    z2 = z1 @ w2.T + params["b2"]
    chn_se = jax.nn.sigmoid(z2)[:, :, None, None] * x_nchw
    s = jnp.einsum("nchw,oc->nohw", x_nchw, wsp)                  # (N,1,H,W)
    spa_se = x_nchw * jax.nn.sigmoid(s)
    return jnp.concatenate([chn_se, spa_se], axis=1)


# --------------------------------- main ------------------------------------ #
if __name__ == "__main__":
    key = jax.random.PRNGKey(0)
    ks = jax.random.split(key, 8)

    N, C, H, W = 2, 32, 16, 16          # S = 256 -> lane-dense last dim
    reduction = 16
    Cr = C // reduction

    params = {
        "w1": jax.random.normal(ks[0], (Cr, C, 1, 1), jnp.float32) * 0.1,
        "b1": jax.random.normal(ks[1], (Cr,), jnp.float32) * 0.1,
        "g1": jnp.ones((Cr,), jnp.float32),            # gain_init = 1.0
        "w2": jax.random.normal(ks[2], (C, Cr, 1, 1), jnp.float32) * 0.1,
        "b2": jax.random.normal(ks[3], (C,), jnp.float32) * 0.1,
        "g2": jnp.ones((C,), jnp.float32),
        "wsp": jax.random.normal(ks[4], (1, C, 1, 1), jnp.float32) * 0.1,
        "gsp": jnp.ones((1,), jnp.float32),
    }
    x = jax.random.normal(ks[5], (N, C, H, W), jnp.float32)

    # f32 path: strict check against the pure-JAX reference.
    out = jax.block_until_ready(scse_scaled_forward(x, params))
    ref = scse_reference(x, params)
    assert out.shape == (N, 2 * C, H, W), out.shape
    assert jnp.allclose(out, ref, atol=1e-4, rtol=1e-4), float(
        jnp.max(jnp.abs(out - ref)))

    # bf16 I/O path (halves HBM traffic); math stays f32 inside the kernel.
    out_bf16 = jax.block_until_ready(
        scse_scaled_forward(x.astype(jnp.bfloat16), params))
    assert out_bf16.dtype == jnp.bfloat16 and out_bf16.shape == (N, 2 * C, H, W)
    assert jnp.allclose(out_bf16.astype(jnp.float32), ref, atol=1e-1, rtol=5e-2)

    print("KERNEL_OK")
</pallas_src>

<mosaic_0001>
module attributes {stable_mosaic.version = 11 : i64} {
  func.func @scse_kernel(%arg0: i32, %arg1: memref<1x32x256xf32, #tpu.memory_space<vmem>>, %arg2: memref<32x2xf32, #tpu.memory_space<vmem>>, %arg3: memref<1x2xf32, #tpu.memory_space<vmem>>, %arg4: memref<32x2xf32, #tpu.memory_space<vmem>>, %arg5: memref<32x1xf32, #tpu.memory_space<vmem>>, %arg6: memref<1x32xf32, #tpu.memory_space<vmem>>, %arg7: memref<1x64x256xf32, #tpu.memory_space<vmem>>) attributes {dimension_semantics = [#tpu.dimension_semantics<parallel>], iteration_bounds = array<i64: 2>, scalar_prefetch = 0 : i64, scratch_operands = 0 : i64, tpu.core_type = #tpu.core_type<tc>, window_params = [{transform_indices = @transform_0, window_bounds = array<i64: 1, 32, 256>}, {pipeline_mode = #tpu.pipeline_mode<synchronous>, transform_indices = @transform_1, window_bounds = array<i64: 32, 2>}, {pipeline_mode = #tpu.pipeline_mode<synchronous>, transform_indices = @transform_2, window_bounds = array<i64: 1, 2>}, {pipeline_mode = #tpu.pipeline_mode<synchronous>, transform_indices = @transform_3, window_bounds = array<i64: 32, 2>}, {pipeline_mode = #tpu.pipeline_mode<synchronous>, transform_indices = @transform_4, window_bounds = array<i64: 32, 1>}, {pipeline_mode = #tpu.pipeline_mode<synchronous>, transform_indices = @transform_5, window_bounds = array<i64: 1, 32>}, {transform_indices = @transform_6, window_bounds = array<i64: 1, 64, 256>}]} {
    %c0 = arith.constant 0 : index
    %c0_0 = arith.constant 0 : index
    %0 = vector.load %arg2[%c0, %c0_0] : memref<32x2xf32, #tpu.memory_space<vmem>>, vector<32x2xf32>
    %c0_1 = arith.constant 0 : index
    %c0_2 = arith.constant 0 : index
    %1 = vector.load %arg3[%c0_1, %c0_2] : memref<1x2xf32, #tpu.memory_space<vmem>>, vector<1x2xf32>
    %c0_3 = arith.constant 0 : index
    %c0_4 = arith.constant 0 : index
    %2 = vector.load %arg4[%c0_3, %c0_4] : memref<32x2xf32, #tpu.memory_space<vmem>>, vector<32x2xf32>
    %c0_5 = arith.constant 0 : index
    %c0_6 = arith.constant 0 : index
    %3 = vector.load %arg5[%c0_5, %c0_6] : memref<32x1xf32, #tpu.memory_space<vmem>>, vector<32x1xf32>
    %c0_7 = arith.constant 0 : index
    %c0_8 = arith.constant 0 : index
    %4 = vector.load %arg6[%c0_7, %c0_8] : memref<1x32xf32, #tpu.memory_space<vmem>>, vector<1x32xf32>
    %c0_9 = arith.constant 0 : index
    %c0_10 = arith.constant 0 : index
    %c0_11 = arith.constant 0 : index
    %5 = vector.load %arg1[%c0_9, %c0_10, %c0_11] : memref<1x32x256xf32, #tpu.memory_space<vmem>>, vector<1x32x256xf32>
    %6 = vector.shape_cast %5 : vector<1x32x256xf32> to vector<32x256xf32>
    %cst = arith.constant dense<0.000000e+00> : vector<32xf32>
    %7 = vector.multi_reduction <add>, %6, %cst [1] : vector<32x256xf32> to vector<32xf32>
    %8 = vector.shape_cast %7 : vector<32xf32> to vector<32x1xf32>
    %cst_12 = arith.constant 2.560000e+02 : f32
    %9 = vector.broadcast %cst_12 : f32 to vector<32x1xf32>
    %10 = arith.divf %8, %9 : vector<32x1xf32>
    %11 = vector.broadcast %10 : vector<32x1xf32> to vector<32x2xf32>
    %12 = arith.mulf %0, %11 : vector<32x2xf32>
    %cst_13 = arith.constant dense<0.000000e+00> : vector<2xf32>
    %13 = vector.multi_reduction <add>, %12, %cst_13 [0] : vector<32x2xf32> to vector<2xf32>
    %14 = vector.shape_cast %13 : vector<2xf32> to vector<1x2xf32>
    %15 = arith.addf %14, %1 : vector<1x2xf32>
    %cst_14 = arith.constant 5.000000e-01 : f32
    %16 = vector.broadcast %cst_14 : f32 to vector<1x2xf32>
    %17 = arith.mulf %16, %15 : vector<1x2xf32>
    %cst_15 = arith.constant 0.707106769 : f32
    %18 = vector.broadcast %cst_15 : f32 to vector<1x2xf32>
    %19 = arith.mulf %15, %18 : vector<1x2xf32>
    %20 = math.erf %19 : vector<1x2xf32>
    %cst_16 = arith.constant 1.000000e+00 : f32
    %21 = vector.broadcast %cst_16 : f32 to vector<1x2xf32>
    %22 = arith.addf %21, %20 : vector<1x2xf32>
    %23 = arith.mulf %17, %22 : vector<1x2xf32>
    %cst_17 = arith.constant 1.70150435 : f32
    %24 = vector.broadcast %cst_17 : f32 to vector<1x2xf32>
    %25 = arith.mulf %23, %24 : vector<1x2xf32>
    %26 = vector.broadcast %25 : vector<1x2xf32> to vector<32x2xf32>
    %27 = arith.mulf %2, %26 : vector<32x2xf32>
    %cst_18 = arith.constant dense<0.000000e+00> : vector<32xf32>
    %28 = vector.multi_reduction <add>, %27, %cst_18 [1] : vector<32x2xf32> to vector<32xf32>
    %29 = vector.shape_cast %28 : vector<32xf32> to vector<32x1xf32>
    %30 = arith.addf %29, %3 : vector<32x1xf32>
    %31 = arith.negf %30 : vector<32x1xf32>
    %32 = math.exp %31 : vector<32x1xf32>
    %cst_19 = arith.constant 1.000000e+00 : f32
    %33 = vector.broadcast %cst_19 : f32 to vector<32x1xf32>
    %34 = arith.addf %33, %32 : vector<32x1xf32>
    %35 = arith.divf %33, %34 : vector<32x1xf32>
    %cst_20 = arith.constant dense<0.000000e+00> : vector<1x256xf32>
    %36 = tpu.matmul %4, %6, %cst_20 {dimension_numbers = #tpu.dot_dimension_numbers<[1], [0], [0], [1], [0, 0, 1, 1], [], []>} : vector<1x32xf32>, vector<32x256xf32>, vector<1x256xf32> -> vector<1x256xf32>
    %37 = arith.negf %36 : vector<1x256xf32>
    %38 = math.exp %37 : vector<1x256xf32>
    %cst_21 = arith.constant 1.000000e+00 : f32
    %39 = vector.broadcast %cst_21 : f32 to vector<1x256xf32>
    %40 = arith.addf %39, %38 : vector<1x256xf32>
    %41 = arith.divf %39, %40 : vector<1x256xf32>
    %42 = vector.broadcast %35 : vector<32x1xf32> to vector<32x256xf32>
    %43 = arith.mulf %6, %42 : vector<32x256xf32>
    %c0_22 = arith.constant 0 : index
    %c0_23 = arith.constant 0 : index
    %c0_24 = arith.constant 0 : index
    %44 = vector.load %arg7[%c0_22, %c0_23, %c0_24] : memref<1x64x256xf32, #tpu.memory_space<vmem>>, vector<1x32x256xf32>
    %45 = vector.shape_cast %44 : vector<1x32x256xf32> to vector<32x256xf32>
    %46 = vector.shape_cast %43 : vector<32x256xf32> to vector<1x32x256xf32>
    tpu.vector_store %arg7[%c0_22, %c0_23, %c0_24], %46 {strides = array<i32>} : memref<1x64x256xf32, #tpu.memory_space<vmem>>, vector<1x32x256xf32>,
    %47 = vector.broadcast %41 : vector<1x256xf32> to vector<32x256xf32>
    %48 = arith.mulf %6, %47 : vector<32x256xf32>
    %c0_25 = arith.constant 0 : index
    %c32 = arith.constant 32 : index
    %c0_26 = arith.constant 0 : index
    %49 = vector.load %arg7[%c0_25, %c32, %c0_26] : memref<1x64x256xf32, #tpu.memory_space<vmem>>, vector<1x32x256xf32>
    %50 = vector.shape_cast %49 : vector<1x32x256xf32> to vector<32x256xf32>
    %51 = vector.shape_cast %48 : vector<32x256xf32> to vector<1x32x256xf32>
    tpu.vector_store %arg7[%c0_25, %c32, %c0_26], %51 {strides = array<i32>} : memref<1x64x256xf32, #tpu.memory_space<vmem>>, vector<1x32x256xf32>,
    return
  }
  func.func @transform_0(%arg0: i32) -> (i32, i32, i32) {
    %c0_i32 = arith.constant 0 : i32
    %c0_i32_0 = arith.constant 0 : i32
    %c0_i32_1 = arith.constant 0 : i32
    return %arg0, %c0_i32, %c0_i32_0 : i32, i32, i32
  }
  func.func @transform_1(%arg0: i32) -> (i32, i32) {
    %c0_i32 = arith.constant 0 : i32
    %c0_i32_0 = arith.constant 0 : i32
    %c0_i32_1 = arith.constant 0 : i32
    return %c0_i32, %c0_i32_0 : i32, i32
  }
  func.func @transform_2(%arg0: i32) -> (i32, i32) {
    %c0_i32 = arith.constant 0 : i32
    %c0_i32_0 = arith.constant 0 : i32
    %c0_i32_1 = arith.constant 0 : i32
    return %c0_i32, %c0_i32_0 : i32, i32
  }
  func.func @transform_3(%arg0: i32) -> (i32, i32) {
    %c0_i32 = arith.constant 0 : i32
    %c0_i32_0 = arith.constant 0 : i32
    %c0_i32_1 = arith.constant 0 : i32
    return %c0_i32, %c0_i32_0 : i32, i32
  }
  func.func @transform_4(%arg0: i32) -> (i32, i32) {
    %c0_i32 = arith.constant 0 : i32
    %c0_i32_0 = arith.constant 0 : i32
    %c0_i32_1 = arith.constant 0 : i32
    return %c0_i32, %c0_i32_0 : i32, i32
  }
  func.func @transform_5(%arg0: i32) -> (i32, i32) {
    %c0_i32 = arith.constant 0 : i32
    %c0_i32_0 = arith.constant 0 : i32
    %c0_i32_1 = arith.constant 0 : i32
    return %c0_i32, %c0_i32_0 : i32, i32
  }
  func.func @transform_6(%arg0: i32) -> (i32, i32, i32) {
    %c0_i32 = arith.constant 0 : i32
    %c0_i32_0 = arith.constant 0 : i32
    %c0_i32_1 = arith.constant 0 : i32
    return %arg0, %c0_i32, %c0_i32_0 : i32, i32, i32
  }
}

</mosaic_0001>

<bundles_post_ra>
// kernel: tpu_custom_call.1
= control target key start
LH: loop header
LB: loop body
LE: loop exit
PB: predicated region body
PF: predicated region fallthrough
CT: control target
= control target key end

     0   :  { %11 = vsyncpa [#allocation3], 0  ;;  %s1128_s0 = inlined_call_operand.hbm [shape: f32[2,32,256], index: 0, kind: input, shape index: {}]   ;;  %s1129_s1 = inlined_call_operand.vmem [shape: f32[32,2], index: 1, kind: input, shape index: {}]   ;;  %s1130_s2 = inlined_call_operand.vmem [shape: f32[1,2], index: 2, kind: input, shape index: {}]   ;;  %s1131_s3 = inlined_call_operand.vmem [shape: f32[32,2], index: 3, kind: input, shape index: {}]   ;;  %s1132_s4 = inlined_call_operand.vmem [shape: f32[32,1], index: 4, kind: input, shape index: {}]   ;;  %s1133_s5 = inlined_call_operand.vmem [shape: f32[1,32], index: 5, kind: input, shape index: {}]   ;;  %s1134_s6 = inlined_call_operand.hbm [shape: f32[2,64,256], index: 6, kind: output, shape index: {}]  }
   0x1   :  { %13 = vsyncpa [#allocation3 + $0x1], 0 }
   0x2   :  { %14 = vsyncpa [#allocation4], 0 }
   0x3   :  { %16 = vsyncpa [#allocation4 + $0x1], 0  ;;  %s856_s21 = smov 0   ;;  %s858_s22 = smov 0  }
   0x4   :  { %s860_s23 = smov 0   ;;  %s862_s24 = smov 0  }
   0x5 LB: > { %s877_s25 = sadd.s32 4294967295, %s811_s24   ;;  %s616_s26 = sadd.s32 4294967294, %s811_s24   ;;  %s811_s24 = sphi %s862_s24, %s1149_s24   ;;  %s807_s23 = sphi %s860_s23, %s1148_s23   ;;  %s803_s22 = sphi %s858_s22, %s1147_s22   ;;  %s799_s21 = sphi %s856_s21, %s1146_s21  }
   0x6   : > { %s881_s27 = sadd.s32 1, %s811_s24   ;;  %s29_s28 = sadd.s32 1, %s807_s23 }
   0x7   : > { %s26_s29 = ssub.s32 %s811_s24, %s881_s27  ;;  %p36_p0 = scmp.ne.s32.totalorder %s807_s23, %s803_s22 }
   0x8   : > { %p27_p1 = scmp.eq.s32.totalorder %s26_s29, 0  ;;  %p37_p2 = scmp.eq.s32.totalorder %s811_s24, 0 }
   0x9   : > { %p42_p3 = scmp.ne.s32.totalorder %s803_s22, %s799_s21  ;;  %p43_p4 = scmp.eq.s32.totalorder %s877_s25, 0 }
   0xa   : > { %s893_s30 = scalar_select %p27_p1, %s807_s23, %s29_s28  }
   0xb   : > { %p895_p5 = por %p37_p2, %p36_p0  ;;  %p899_p6 = por %p43_p4, %p42_p3 }
   0xc   : > { %p171_p7 = scmp.eq.s32.totalorder %s877_s25, 1  ;;  %p177_p8 = scmp.eq.s32.totalorder %s616_s26, 1 }
   0xd   : > { %s1138_s8 = scalar_select %p899_p6, 1, 0 }
   0xe   : > { %p651_p10 = scmp.lt.s32.totalorder %s811_s24, 2  ;;  %p906_p11 = por %p171_p7, %p36_p0 }
   0xf   : > { %p910_p12 = por %p177_p8, %p42_p3  ;;  %s212_s11 = sand.u32 1, %s807_s23  }
  0x10   : > { %s1139_s9 = scalar_select %p906_p11, 1, 0 }
  0x11   : > { %s1140_s10 = scalar_select %p910_p12, 1, 0 }
  0x12   : > { %s637_s12 = sshll.u32 %s811_s24, 10  ;;  %s619_s13 = sshll.u32 %s212_s11, 6 }
  0x13   : > { %s919_s16 = scalar_lea.hbm %s1128_s0, %s637_s12  ;;  %s216_s17 = scalar_lea.vmem [#allocation2], %s619_s13 }
  0x14   : > { %s223_s18 = sshll.u32 %s216_s17, 4  ;;  %p923_p13 = pnand %p651_p10, %p895_p5  ;;  %s927_s18 = int_to_ptr.vmem [resolvable:$true] %s223_s18 }
  0x15   : > { %s929_s20 = scalar_lea.sflag [#allocation3], %s212_s11  ;;  %s719_s26 = scalar_lea.hbm %s919_s16, 1024 }
  0x16   : > { %p720_p0 = scmp.ne.s32.totalorder %s919_s16, %s719_s26  ;;  %p721_p1 = pneg %p923_p13 }
  0x17   : > { %s724_s12 = scalar_lea.hbm %s1128_s0, 2048  ;;  %p725_p4 = scmp.lt.s32.totalorder %s919_s16, %s1128_s0 }
  0x18   : > { %p722_p2 = pnand %p721_p1, %p720_p0  ;;  %p726_p5 = scmp.lt.s32.totalorder %s724_s12, %s719_s26 }
  0x1a   : > { %p723_p3 = pneg %p722_p2  ;;  %p727_p7 = por %p726_p5, %p725_p4 }
  0x1c   : > { %p728_p8 = pnand %p727_p7, %p723_p3 }
  0x1e   : > { %731 = shalt.err (!%p728_p8)
}
  0x1f   : > { %s732_s11 = scalar_lea.vmem %s927_s18, 1024  ;;  %s813_s14 = smov [#allocation2]  }
  0x20   : > { %p733_p10 = scmp.ne.s32.totalorder %s927_s18, %s732_s11  ;;  %s737_s15 = sshll.u32 %s813_s14, 4  ;;  %s738_s15 = int_to_ptr.vmem [resolvable:$false] %s737_s15 }
  0x21   : > { %s739_s17 = scalar_lea.vmem %s738_s15, 2048  ;;  %p740_p2 = scmp.lt.s32.totalorder %s927_s18, %s738_s15 }
  0x22   : > { %p735_p9 = pnand %p733_p10, %p721_p1  ;;  %p741_p12 = scmp.lt.s32.totalorder %s739_s17, %s732_s11 }
  0x24   : > { %p736_p0 = pneg %p735_p9  ;;  %p742_p11 = por %p741_p12, %p740_p2 }
  0x26   : > { %p743_p6 = pnand %p742_p11, %p736_p0 }
  0x28   : > { %746 = shalt.err (!%p743_p6)
}
  0x29   : > { %s814_s26 = smov 256   ;;  %s815_s28 = smov 16  }
  0x2a   : > { %646 = dma.hbm_to_vmem [thread:$0]  (!%p923_p13), %s919_s16, 1024, %s927_s18, %s929_s20, %s814_s26, %s814_s26, %s815_s28  }
  0x2b   : > { %p622_p9 = scmp.ge.s32.totalorder %s811_s24, 1  ;;  %p231_p1 = scmp.lt.s32.totalorder %s811_s24, 3 }
  0x2d   : > { %p232_p3 = pnand %p622_p9, %p231_p1 }
  0x2e   : > { %s953_s29 = sand.u32 (!%p232_p3), 1, %s803_s22   ;;  %p1142_p6 = scmp.ne.s32.totalorder (!%p232_p3), %s1138_s8, 0 }
  0x2f   : > { %235 = sbr.rel (%p232_p3) target bundleno = 571 (0x23b), region = 44  ;;  %s623_s12 = sshll.u32 (!%p232_p3), %s953_s29, 6 }
  0x30   : > { %s238_s7 = scalar_lea.sflag (!%p232_p3), [#allocation3], %s953_s29  ;;  %s241_s13 = scalar_lea.vmem (!%p232_p3), [#allocation2], %s623_s12 }
  0x34   : > { %790 = dma.done.wait (%p1142_p6), %s238_s7, 1024  }
  0x35   : > { %792 = vsyncadd (%p1142_p6), %s238_s7, 4294966272  ;;  %v961_v0 = vld [vmem:[%s241_s13] sm:$0xff]  ;;  %v963_v1 = vld [vmem:[%s241_s13 + $0x8] sm:$0xff]  ;;  %vm382_vm0 = vcmask 261120   ;;  %v816_v13 = vmov 0.0   ;;  %vm313_vm1 = vcmask 15360   ;;  %v334_v46 = vlaneseq }
  0x36   : > { %v965_v2 = vld [vmem:[%s241_s13 + $0x20] sm:$0xff]  ;;  %v292_v3 = vadd.f32 %v963_v1, %v961_v0  ;;  %v969_v4 = vld [vmem:[%s241_s13 + $0x28] sm:$0xff]  ;;  %v971_v5 = vld [vmem:[%s241_s13 + $0x10] sm:$0xff]  ;;  %450 = vmatprep.mubr.f32.mxu0 %v816_v13  ;;  %s624_s14 = sshll.u32 %s953_s29, 7  ;;  %s638_s18 = sshll.u32 %s877_s25, 11 }
  0x37   : > { %v973_v6 = vld [vmem:[%s241_s13 + $0x18] sm:$0xff]  ;;  %v298_v7 = vadd.f32 %v969_v4, %v965_v2  ;;  %v977_v8 = vld [vmem:[%s241_s13 + $0x30] sm:$0xff]  ;;  %v283_v12 = vld [vmem:[%s1133_s5] sm:$0x1]  ;;  %v335_v47 = vshrl.u32 %v334_v46, 7  ;;  %s1036_s15 = scalar_lea.vmem [#allocation5], %s624_s14  ;;  %s1079_s14 = scalar_lea.hbm %s1134_s6, %s638_s18 }
  0x38   : > { %v979_v9 = vld [vmem:[%s241_s13 + $0x38] sm:$0xff]  ;;  %293 = vadd.xlane.f32.xlu0 %v292_v3  ;;  %v295_v10 = vadd.f32 %v973_v6, %v971_v5  ;;  %v270_v17 = vld [vmem:[%s1129_s1] sm:$0xff]  ;;  %v272_v19 = vld [vmem:[%s1129_s1 + $0x10] sm:$0xff]  ;;  %s543_s19 = sshll.u32 %s1036_s15, 4  ;;  %s530_s25 = scalar_lea.sflag [#allocation4], %s953_s29  ;;  %s1081_s19 = int_to_ptr.vmem [resolvable:$true] %s543_s19 }
  0x39   : > { %410 = vmatprep.subr.mxu0 %v979_v9  ;;  %299 = vadd.xlane.f32.xlu1 %v298_v7  ;;  %v301_v11 = vadd.f32 %v979_v9, %v977_v8  ;;  %v271_v21 = vld [vmem:[%s1129_s1 + $0x8] sm:$0xff]  ;;  %v273_v25 = vld [vmem:[%s1129_s1 + $0x18] sm:$0xff]  ;;  %v274_v42 = vld [vmem:[%s1130_s2] sm:$0x1]  ;;  %v336_v52 = vsub.s32 0, %v335_v47  ;;  %s747_s17 = scalar_lea.vmem %s1081_s19, 2048 }
  0x3a   : > { %411 = vmatpush1.msra.mxu0 %v977_v8  ;;  %v276_v54 = vld [vmem:[%s1131_s3 + $0x8] sm:$0xff]  ;;  %v275_v55 = vld [vmem:[%s1131_s3] sm:$0xff]  ;;  %v278_v57 = vld [vmem:[%s1131_s3 + $0x18] sm:$0xff]  ;;  %p748_p11 = scmp.ne.s32.totalorder %s1081_s19, %s747_s17  ;;  %p1143_p12 = scmp.ne.s32.totalorder %s1139_s9, 0 }
  0x3b   : > { %412 = vmatprep.subr.mxu0 %v969_v4  ;;  %v277_v58 = vld [vmem:[%s1131_s3 + $0x10] sm:$0xff]  ;;  %s818_s26 = smov [#allocation5]  }
  0x3c   : > { %413 = vmatpush1.msra.mxu0 %v965_v2  ;;  %296 = vadd.xlane.f32.xlu0 %v295_v10  ;;  %p749_p13 = pnand %p748_p11, %p1143_p12  ;;  %s751_s28 = sshll.u32 %s818_s26, 4  ;;  %s752_s28 = int_to_ptr.vmem [resolvable:$false] %s751_s28 }
  0x3d   : > { %414 = vmatprep.subr.mxu0 %v973_v6  ;;  %302 = vadd.xlane.f32.xlu1 %v301_v11  ;;  %v817_v11 = vmov 0   ;;  %s753_s12 = scalar_lea.vmem %s752_s28, 4096  ;;  %p754_p5 = scmp.lt.s32.totalorder %s1081_s19, %s752_s28 }
  0x3e   : > { %415 = vmatpush1.msra.mxu0 %v971_v5  ;;  %692 = vset.pattern.permute.xlu1 %v817_v11  ;;  %p750_p4 = pneg %p749_p13  ;;  %p755_p7 = scmp.lt.s32.totalorder %s753_s12, %s747_s17 }
  0x3f   : > { %416 = vmatprep.subr.mxu0 %v963_v1  ;;  %691 = vset.pattern.permute.xlu0 %v817_v11 }
  0x40   : > { %417 = vmatpush1.msra.mxu0 %v961_v0  ;;  %p756_p8 = por %p755_p7, %p754_p5 }
  0x41   : > { %629 = vmatmul.mubr.msk.f32.vlgmr.msra.gmra.mxu0 %vm382_vm0, %v283_v12 }
  0x42   : > { %p757_p10 = pnand %p756_p8, %p750_p4 }
  0xc1   : > { %v294_v14 = vpop.xlane.xlu0 %293 }
  0xc2   : > { %v305_v15 = vmul.f32 0.00390625, %v294_v14  ;;  %v300_v16 = vpop.xlane.xlu1 %299 }
  0xc3   : > { %v307_v18 = vmul.f32 0.00390625, %v300_v16 }
  0xc4   : > { %v309_v22 = vmul.f32 %v305_v15, %v270_v17 }
  0xc5   : > { %v297_v20 = vpop.xlane.xlu0 %296  ;;  %v311_v27 = vmul.f32 %v307_v18, %v272_v19 }
  0xc6   : > { %v306_v23 = vmul.f32 0.00390625, %v297_v20  ;;  %v303_v24 = vpop.xlane.xlu1 %302  ;;  %v314_v30 = vsel %vm313_vm1, %v309_v22, 0.0 }
  0xc7   : > { %v308_v26 = vmul.f32 0.00390625, %v303_v24  ;;  %v317_v33 = vsel %vm313_vm1, %v311_v27, 0.0 }
  0xc8   : > { %v310_v28 = vmul.f32 %v306_v23, %v271_v21 }
  0xc9   : > { %v312_v29 = vmul.f32 %v308_v26, %v273_v25 }
  0xca   : > { %v315_v31 = vsel %vm313_vm1, %v310_v28, 0.0 }
  0xcb   : > { %v316_v32 = vadd.f32 %v315_v31, %v314_v30  ;;  %v319_v34 = vsel %vm313_vm1, %v312_v29, 0.0 }
  0xcd   : > { %v318_v35 = vadd.f32 %v317_v33, %v316_v32  ;;  %v280_v32 = vld [vmem:[%s1132_s4 + $0x8] sm:$0xff]  ;;  %v279_v33 = vld [vmem:[%s1132_s4] sm:$0xff] }
  0xcf   : > { %v320_v36 = vadd.f32 %v319_v34, %v318_v35 }
  0xd1   : > { %v321_v37 = vrot.slane %v320_v36, 4 }
  0xd3   : > { %v322_v38 = vadd.f32 %v321_v37, %v320_v36 }
  0xd5   : > { %v323_v39 = vrot.slane %v322_v38, 2 }
  0xd7   : > { %v324_v40 = vadd.f32 %v323_v39, %v322_v38  ;;  %v282_v38 = vld [vmem:[%s1132_s4 + $0x18] sm:$0xff]  ;;  %v281_v39 = vld [vmem:[%s1132_s4 + $0x10] sm:$0xff] }
  0xd9   : > { %v325_v41 = vrot.slane %v324_v40, 1 }
  0xdb   : > { %v326_v43 = vadd.f32 %v325_v41, %v324_v40 }
  0xdd   : > { %v327_v44 = vadd.f32 %v326_v43, %v274_v42 }
  0xdf   : > { %v329_v45 = vmul.f32 0.70710677, %v327_v44  ;;  %v328_v49 = vmul.f32 0.5, %v327_v44 }
  0xe1   : > { %693 = verf.f32 %v329_v45 }
  0xee   : > { %v694_v48 = vpop.eup %693 }
  0xef   : > { %v331_v50 = vadd.f32 1.0, %v694_v48 }
  0xf1   : > { %v332_v51 = vmul.f32 %v331_v50, %v328_v49 }
  0xf3   : > { %v333_v53 = vmul.f32 1.7015043, %v332_v51 }
  0xf5   : > { %v337_v56 = vrot.slane %v333_v53, %v336_v52 }
  0xf7   : > { %v339_v59 = vmul.f32 %v337_v56, %v276_v54  ;;  %v338_v60 = vmul.f32 %v337_v56, %v275_v55  ;;  %v341_v63 = vmul.f32 %v337_v56, %v278_v57  ;;  %v340_v3 = vmul.f32 %v337_v56, %v277_v58 }
  0xf9   : > { %v345_v61 = vsel %vm313_vm1, %v339_v59, 0.0  ;;  %v342_v62 = vsel %vm313_vm1, %v338_v60, 0.0  ;;  %v351_v7 = vsel %vm313_vm1, %v341_v63, 0.0  ;;  %v348_v10 = vsel %vm313_vm1, %v340_v3, 0.0 }
  0xfa   : > { %346 = vadd.xlane.f32.xlu1 %v345_v61  ;;  %343 = vadd.xlane.f32.xlu0 %v342_v62 }
  0xfe   : > { %352 = vadd.xlane.f32.xlu1 %v351_v7  ;;  %349 = vadd.xlane.f32.xlu0 %v348_v10 }
 0x101   : > { %v452_v12 = vpop.f32.mrf.mxu0 }
 0x102   : > { %v630_v13 = vmul.f32 -1.442695, %v452_v12 }
 0x103   : > { %v454_v14 = vpop.f32.mrf.mxu0 }
 0x104   : > { %695 = vpow2.f32 %v630_v13  ;;  %v631_v15 = vmul.f32 -1.442695, %v454_v14 }
 0x106   : > { %697 = vpow2.f32 %v631_v15 }
 0x111   : > { %v696_v16 = vpop.eup %695 }
 0x112   : > { %v463_v17 = vadd.f32 1.0, %v696_v16 }
 0x113   : > { %v698_v18 = vpop.eup %697 }
 0x114   : > { %699 = vrcp.f32 %v463_v17  ;;  %v464_v19 = vadd.f32 1.0, %v698_v18 }
 0x116   : > { %701 = vrcp.f32 %v464_v19 }
 0x121   : > { %v700_v20 = vpop.eup %699 }
 0x122   : > { %v508_v21 = vrot.slane %v700_v20, %v336_v52 }
 0x123   : > { %v702_v22 = vpop.eup %701 }
 0x124   : > { %v513_v23 = vmul.f32 %v508_v21, %v961_v0  ;;  %v515_v24 = vmul.f32 %v508_v21, %v971_v5  ;;  %v517_v25 = vmul.f32 %v508_v21, %v965_v2  ;;  %v519_v26 = vmul.f32 %v508_v21, %v977_v8 }
 0x125   : > { %v512_v27 = vrot.slane %v702_v22, %v336_v52 }
 0x126   : > { %521 = vst [vmem:[%s1036_s15 + $0x40] sm:$0xff] %v513_v23  ;;  %523 = vst [vmem:[%s1036_s15 + $0x50] sm:$0xff] %v515_v24 }
 0x127   : > { %525 = vst [vmem:[%s1036_s15 + $0x60] sm:$0xff] %v517_v25  ;;  %527 = vst [vmem:[%s1036_s15 + $0x70] sm:$0xff] %v519_v26  ;;  %v514_v28 = vmul.f32 %v512_v27, %v963_v1  ;;  %v516_v29 = vmul.f32 %v512_v27, %v973_v6  ;;  %v518_v30 = vmul.f32 %v512_v27, %v969_v4 }
 0x128   : > { %v520_v31 = vmul.f32 %v512_v27, %v979_v9 }
 0x129   : > { %522 = vst [vmem:[%s1036_s15 + $0x48] sm:$0xff] %v514_v28  ;;  %524 = vst [vmem:[%s1036_s15 + $0x58] sm:$0xff] %v516_v29 }
 0x12a   : > { %526 = vst [vmem:[%s1036_s15 + $0x68] sm:$0xff] %v518_v30  ;;  %528 = vst [vmem:[%s1036_s15 + $0x78] sm:$0xff] %v520_v31 }
 0x183   : > { %v347_v34 = vpop.xlane.xlu1 %346  ;;  %v344_v35 = vpop.xlane.xlu0 %343 }
 0x184   : > { %v355_v36 = vadd.f32 %v347_v34, %v280_v32  ;;  %v354_v37 = vadd.f32 %v344_v35, %v279_v33 }
 0x186   : > { %v626_v40 = vmul.f32 -1.442695, %v355_v36  ;;  %v625_v41 = vmul.f32 -1.442695, %v354_v37 }
 0x187   : > { %v353_v42 = vpop.xlane.xlu1 %352  ;;  %v350_v43 = vpop.xlane.xlu0 %349 }
 0x188   : > { %703 = vpow2.f32 %v626_v40  ;;  %v357_v44 = vadd.f32 %v353_v42, %v282_v38  ;;  %v356_v45 = vadd.f32 %v350_v43, %v281_v39 }
 0x189   : > { %705 = vpow2.f32 %v625_v41 }
 0x18a   : > { %v628_v46 = vmul.f32 -1.442695, %v357_v44  ;;  %v627_v47 = vmul.f32 -1.442695, %v356_v45 }
 0x18c   : > { %707 = vpow2.f32 %v628_v46 }
 0x18d   : > { %709 = vpow2.f32 %v627_v47 }
 0x195   : > { %v704_v48 = vpop.eup %703 }
 0x196   : > { %v706_v49 = vpop.eup %705  ;;  %v371_v50 = vadd.f32 1.0, %v704_v48 }
 0x197   : > { %v370_v51 = vadd.f32 1.0, %v706_v49 }
 0x198   : > { %711 = vrcp.f32 %v371_v50 }
 0x199   : > { %v708_v52 = vpop.eup %707  ;;  %713 = vrcp.f32 %v370_v51 }
 0x19a   : > { %v710_v53 = vpop.eup %709  ;;  %v373_v55 = vadd.f32 1.0, %v708_v52 }
 0x19b   : > { %v372_v54 = vadd.f32 1.0, %v710_v53 }
 0x19d   : > { %715 = vrcp.f32 %v372_v54 }
 0x19e   : > { %717 = vrcp.f32 %v373_v55 }
 0x1a5   : > { %v712_v56 = vpop.eup %711 }
 0x1a6   : > { %v714_v57 = vpop.eup %713  ;;  %476 = vperm.xlu1 %692, %v712_v56  }
 0x1a7   : > { %471 = vperm.xlu0 %691, %v714_v57  }
 0x1aa   : > { %v716_v58 = vpop.eup %715 }
 0x1ab   : > { %481 = vperm.xlu1 %692, %v716_v58   ;;  %v718_v59 = vpop.eup %717 }
 0x1af   : > { %486 = vperm.xlu1 %692, %v718_v59  }
 0x221   : > { %v477_v60 = vpop.permute.xlu1 %476 }
 0x222   : > { %v491_v61 = vmul.f32 %v477_v60, %v971_v5  ;;  %v492_v62 = vmul.f32 %v477_v60, %v973_v6  ;;  %v472_v63 = vpop.permute.xlu0 %471 }
 0x223   : > { %v489_v3 = vmul.f32 %v472_v63, %v961_v0  ;;  %v490_v7 = vmul.f32 %v472_v63, %v963_v1 }
 0x224   : > { %499 = vst [vmem:[%s1036_s15 + $0x10] sm:$0xff] %v491_v61  ;;  %500 = vst [vmem:[%s1036_s15 + $0x18] sm:$0xff] %v492_v62 }
 0x225   : > { %497 = vst [vmem:[%s1036_s15] sm:$0xff] %v489_v3  ;;  %498 = vst [vmem:[%s1036_s15 + $0x8] sm:$0xff] %v490_v7 }
 0x226   : > { %v482_v10 = vpop.permute.xlu1 %481 }
 0x227   : > { %v493_v11 = vmul.f32 %v482_v10, %v965_v2  ;;  %v494_v5 = vmul.f32 %v482_v10, %v969_v4 }
 0x229   : > { %501 = vst [vmem:[%s1036_s15 + $0x20] sm:$0xff] %v493_v11  ;;  %502 = vst [vmem:[%s1036_s15 + $0x28] sm:$0xff] %v494_v5 }
 0x22a   : > { %v487_v0 = vpop.permute.xlu1 %486 }
 0x22b   : > { %v495_v1 = vmul.f32 %v487_v0, %v977_v8  ;;  %v496_v2 = vmul.f32 %v487_v0, %v979_v9 }
 0x22d   : > { %503 = vst [vmem:[%s1036_s15 + $0x30] sm:$0xff] %v495_v1  ;;  %504 = vst [vmem:[%s1036_s15 + $0x38] sm:$0xff] %v496_v2 }
 0x22e   : > { %760 = shalt.err (!%p757_p10)
}
 0x22f   : > { %s761_s15 = scalar_lea.hbm %s1079_s14, 2048  ;;  %s765_s8 = scalar_lea.hbm %s1134_s6, 4096 }
 0x230   : > { %p762_p0 = scmp.ne.s32.totalorder %s1079_s14, %s761_s15  ;;  %p766_p1 = scmp.lt.s32.totalorder %s1079_s14, %s1134_s6 }
 0x231   : > { %p767_p3 = scmp.lt.s32.totalorder %s765_s8, %s761_s15 }
 0x232   : > { %p763_p2 = pnand %p762_p0, %p1143_p12 }
 0x233   : > { %p768_p6 = por %p767_p3, %p766_p1 }
 0x234   : > { %p764_p9 = pneg %p763_p2 }
 0x236   : > { %p769_p11 = pnand %p768_p6, %p764_p9 }
 0x238   : > { %772 = shalt.err (!%p769_p11)
}
 0x239   : > { %s819_s20 = smov 256   ;;  %s820_s11 = smov 16  }
 0x23a   : > { %641 = dma.vmem_to_hbm [thread:$0]  (%p1143_p12), %s1081_s19, 2048, %s1079_s14, %s530_s25, %s819_s20, %s819_s20, %s820_s11  }
 0x23b PF: > { %s558_s17 = sand.u32 1, %s799_s21   ;;  %p1144_p13 = scmp.ne.s32.totalorder %s1140_s10, 0 }
 0x23c   : > { %p1145_p4 = scmp.ge.s32.totalorder %s811_s24, 2  ;;  %s559_s26 = scalar_lea.sflag [#allocation4], %s558_s17 }
 0x23e   : > { %p648_p5 = pnand %p1145_p4, %p1144_p13 }
 0x240   : > { %p649_p7 = pneg %p648_p5 }
 0x242   : > { %794 = dma.done.wait (%p649_p7), %s559_s26, 2048  }
 0x243   : > { %796 = vsyncadd (%p649_p7), %s559_s26, 4294965248  ;;  %p19_p8 = scmp.ge.s32.totalorder %s881_s27, 4   ;;  %s1146_s21 = smov %s803_s22 }
 0x244   : > { %s1147_s22 = smov %s807_s23  ;;  %s1148_s23 = smov %s893_s30 }
 0x245   : > { %s1149_s24 = smov %s881_s27  ;;  %21 = sbr.rel (!%p19_p8) target bundleno = 5 (0x5), region = 89 }
 0x24a   :  { %564 = vsyncpa [#allocation3], 1 }
 0x24b   :  { %566 = vsyncpa [#allocation3 + $0x1], 1 }
 0x24c   :  { %567 = vsyncpa [#allocation4], 1 }
 0x24d   :  { %569 = vsyncpa [#allocation4 + $0x1], 1 }

</bundles_post_ra>
